<compile_context>
chip_gen: v6e
topology: v6e:2x2x1
jax: 0.10.0
libtpu: 0.0.40
codegen_flags: <defaults>
</compile_context>

<pallas_src>
import functools

import jax
import jax.numpy as jnp
from jax.experimental import pallas as pl
from jax.experimental.pallas import tpu as pltpu


def _round_up(x, m):
    return -(-x // m) * m


def _convblock_kernel(xa_ref, xb_ref, w_ref, bias_ref, o_ref, *, w_p, relu):
    # xa_ref:   (1, Cin, Ht*W_p)   flattened padded rows [i*Ht, (i+1)*Ht)          (bf16)
    # xb_ref:   (1, Cin, 8*W_p)    flattened padded rows [(i+1)*Ht, (i+1)*Ht+8)    (bf16)
    # w_ref:    (9, Cout, Cin)     per-tap weights, tap t = kh*3 + kw, BN scale pre-folded
    # bias_ref: (Cout, 1) f32      folded conv/BN bias (zeros if none)
    # o_ref:    (1, Cout, Ht*W_p)  output tile; lane axis = flattened (row, col), 128-multiple
    n_out = xa_ref.shape[2]

    # Window = main tile followed by the 8-row bottom halo.  Both pieces are multiples of
    # 128 lanes, so this concat is lane-aligned (no masked stores, no relayout) -- no VMEM
    # scratch window is allocated.
    win = jnp.concatenate([xa_ref[0], xb_ref[0]], axis=1)          # (Cin, (Ht+8)*W_p)

    # 3x3 conv = 9 accumulating K=Cin matmuls.  Tap (kh, kw) is the window shifted by
    # kh*W_p + kw flattened positions (a uniform lane shift feeding the MXU directly);
    # accumulation stays in f32.  (On v7x the MRB accumulates in place; on v5e/v6e Mosaic
    # keeps a small f32 accumulator -- no im2col materialization either way.)
    acc = None
    for kh in range(3):
        for kw in range(3):
            s = kh * w_p + kw
            tap = win[:, s:s + n_out]                              # (Cin, Ht*W_p)
            part = jnp.dot(w_ref[kh * 3 + kw], tap,
                           preferred_element_type=jnp.float32)
            acc = part if acc is None else acc + part

    y = acc + bias_ref[...]        # per-channel bias (BN scale already folded into weights)
    if relu:
        y = jnp.maximum(y, 0.0)
    o_ref[...] = y.reshape(o_ref.shape).astype(o_ref.dtype)


def _vmem_bytes(shape, itemsize):
    """Layout-accurate VMEM footprint: last dim padded to 128 lanes, second-minor padded to
    8 (f32) / 16 (bf16) sublanes."""
    lanes = _round_up(shape[-1], 128)
    sub = _round_up(shape[-2], 8 * max(1, 4 // itemsize)) if len(shape) >= 2 else 1
    lead = 1
    for d in shape[:-2]:
        lead *= d
    return lead * sub * lanes * itemsize


def _vmem_budget():
    """Generation-aware tile budget / scoped-VMEM limit (v7x: ~24/48 MiB, v5e/v6e: ~48/96)."""
    try:
        cap = int(pltpu.get_tpu_info().vmem_capacity_bytes)
    except Exception:
        cap = 64 * 1024 * 1024          # conservative (v7x-sized) fallback
    cap = max(cap, 32 * 1024 * 1024)
    return (cap * 3) // 8, (cap * 3) // 4     # (tile budget, vmem_limit_bytes)


def _pick_row_tile(h_p, w_p, cin, cout, out_itemsize, batch, budget_bytes):
    """Largest row tile (multiple of 8 dividing h_p) whose per-step VMEM footprint fits."""

    def footprint(ht):
        n_out = ht * w_p
        return (2 * _vmem_bytes((1, cin, n_out), 2)                 # main tile, double-buffered
                + 2 * _vmem_bytes((1, cin, 8 * w_p), 2)             # bottom-halo tile
                + 2 * _vmem_bytes((9, cout, cin), 2)                # weights (resident)
                + 2 * _vmem_bytes((cout, 1), 4)                     # bias
                + 2 * _vmem_bytes((1, cout, n_out), out_itemsize)   # output tile
                + _vmem_bytes((cin, n_out + 8 * w_p), 2)            # concatenated window value
                + 2 * _vmem_bytes((cin, n_out), 2)                  # ~2 live shifted-tap operands
                + 2 * _vmem_bytes((cout, n_out), 4))                # f32 accumulator + dot result

    cands = [ht for ht in range(8, h_p + 1, 8) if h_p % ht == 0]
    if batch == 1 and h_p > 8:
        # Batch gives no grid parallelism here: keep >=2 row tiles so the second grid axis
        # can feed v7x's second TensorCore.  With batch > 1, just take the largest tile.
        preferred = [ht for ht in cands if ht < h_p]
    else:
        preferred = cands
    for ht in sorted(preferred, reverse=True):
        if footprint(ht) <= budget_bytes:
            return ht
    return min(cands)


def conv_block(x_nchw, w_oihw, *, conv_bias=None, gamma=None, beta=None,
               running_mean=None, running_var=None, eps=1e-5, bn=False, relu=True,
               use_xla_fallback=False):
    """ReLU(BN(Conv2d(x))) with kernel=3, stride=1, padding=1, dilation=1 (ConvBlock forward).

    x_nchw: (N, Cin, H, W); w_oihw: (Cout, Cin, 3, 3). Returns (N, Cout, H, W) in x's dtype.
    """
    N, Cin, H, W = x_nchw.shape
    Cout = w_oihw.shape[0]
    assert w_oihw.shape == (Cout, Cin, 3, 3), "only ConvBlock defaults (3x3, s1, p1, d1) supported"
    # TODO(synk): other kernel_size/stride/padding/dilation hyper-parameters are not implemented.
    out_dtype = x_nchw.dtype

    # Fold optional conv bias and eval-mode BatchNorm into per-channel scale/bias; the scale
    # is folded into the weights (one-time O(Cout*9*Cin) op) so the epilogue is bias + ReLU.
    w32 = w_oihw.astype(jnp.float32)
    cb = (jnp.zeros((Cout,), jnp.float32) if conv_bias is None
          else conv_bias.astype(jnp.float32))
    if bn:
        # TODO(synk): eval-mode BatchNorm only (running stats); training-mode batch statistics
        #             are not reproduced here.
        scale = gamma.astype(jnp.float32) / jnp.sqrt(running_var.astype(jnp.float32) + eps)
        bias = beta.astype(jnp.float32) + (cb - running_mean.astype(jnp.float32)) * scale
    else:
        scale = jnp.ones((Cout,), jnp.float32)
        bias = cb
    w_scaled = w32 * scale[:, None, None, None]

    if use_xla_fallback:
        # Small-channel dispatch (review item): when Cout / 9*Cin are far below the MXU tile
        # the Pallas path cannot amortize; callers can opt into the XLA conv instead.
        y = jax.lax.conv_general_dilated(
            x_nchw.astype(jnp.bfloat16), w_scaled.astype(jnp.bfloat16),
            window_strides=(1, 1), padding=((1, 1), (1, 1)),
            dimension_numbers=("NCHW", "OIHW", "NCHW"),
            preferred_element_type=jnp.float32)
        y = y + bias[None, :, None, None]
        if relu:
            y = jnp.maximum(y, 0.0)
        return y.astype(out_dtype)

    # Geometry: W_p >= W+2 (left/right halo columns) and a multiple of 16 so every Ht*W_p
    # block is a multiple of 128 lanes (unmasked lane-dense stores); H_p = H rounded up to 8.
    W_p = _round_up(W + 2, 16)
    H_p = _round_up(H, 8)
    budget, vmem_limit = _vmem_budget()
    Ht = _pick_row_tile(H_p, W_p, Cin, Cout, jnp.dtype(out_dtype).itemsize, N, budget)
    n_row_tiles = H_p // Ht
    halo_step = Ht // 8          # the halo operand is addressed in 8-row blocks

    # One fused HBM pass: bf16 cast + conv-halo / alignment zero padding, then flatten the
    # spatial dims (free, contiguous).  Data sits at rows [1, H+1), cols [1, W+1); the bottom
    # padding is only the minimal 8-row halo block (not a full row tile).
    # TODO(synk): this pad pass is still one extra HBM round-trip of the activations; fusing
    #             it into the kernel's DMA would need per-row strided copies (not done here).
    xp = jnp.pad(x_nchw.astype(jnp.bfloat16),
                 ((0, 0), (0, 0), (1, H_p + 8 - H - 1), (1, W_p - W - 1)))
    xp = xp.reshape(N, Cin, (H_p + 8) * W_p)

    # Weights -> (9, Cout, Cin), tap-major (kh, kw), BN scale pre-folded, bf16 operands.
    w_taps = jnp.transpose(w_scaled, (2, 3, 0, 1)).reshape(9, Cout, Cin).astype(jnp.bfloat16)
    bias2d = bias.reshape(Cout, 1)

    kernel = functools.partial(_convblock_kernel, w_p=W_p, relu=relu)

    out_flat = pl.pallas_call(
        kernel,
        out_shape=jax.ShapeDtypeStruct((N, Cout, H_p * W_p), out_dtype),
        grid_spec=pltpu.PrefetchScalarGridSpec(
            num_scalar_prefetch=0,
            grid=(N, n_row_tiles),
            in_specs=[
                # main row tile, flattened: elements [i*Ht*W_p, (i+1)*Ht*W_p)
                pl.BlockSpec((1, Cin, Ht * W_p), lambda n, i: (n, 0, i)),
                # bottom halo: 8 padded rows starting at row (i+1)*Ht
                pl.BlockSpec((1, Cin, 8 * W_p), lambda n, i: (n, 0, (i + 1) * halo_step)),
                # constant operands (tiny; constant index maps -> fetched once, kept resident)
                pl.BlockSpec((9, Cout, Cin), lambda n, i: (0, 0, 0)),
                pl.BlockSpec((Cout, 1), lambda n, i: (0, 0)),
            ],
            out_specs=pl.BlockSpec((1, Cout, Ht * W_p), lambda n, i: (n, 0, i)),
        ),
        compiler_params=pltpu.CompilerParams(
            dimension_semantics=("parallel", "parallel"),
            vmem_limit_bytes=vmem_limit,
        ),
    )(xp, xp, w_taps, bias2d)

    # Free reshape (metadata only) + slice off the alignment-padding rows/columns.
    return out_flat.reshape(N, Cout, H_p, W_p)[:, :, :H, :W]


if __name__ == "__main__":
    key = jax.random.PRNGKey(0)
    kx, kw_, kg, kb, km, kv = jax.random.split(key, 6)

    # Small shapes consistent with the module: ConvBlock(in_channels=4, out_channels=8)
    N, Cin, H, W = 2, 4, 16, 16
    Cout = 8

    x = jax.random.normal(kx, (N, Cin, H, W), dtype=jnp.float32)
    w = jax.random.normal(kw_, (Cout, Cin, 3, 3), dtype=jnp.float32) * 0.1

    # --- module defaults: bias=False, bn=False, relu=True ------------------------------------
    out = conv_block(x, w, bn=False, relu=True)
    out = jax.block_until_ready(out)
    assert out.shape == (N, Cout, H, W)

    # Reference with the same bf16 operand rounding and f32 accumulation
    # (== nn.Conv2d(bias=False) + ReLU at the kernel's compute precision).
    ref = jax.lax.conv_general_dilated(
        x.astype(jnp.bfloat16), w.astype(jnp.bfloat16),
        window_strides=(1, 1), padding=((1, 1), (1, 1)),
        dimension_numbers=("NCHW", "OIHW", "NCHW"),
        preferred_element_type=jnp.float32)
    ref = jnp.maximum(ref, 0.0).astype(out.dtype)
    assert jnp.allclose(out, ref, atol=1e-2, rtol=1e-2), float(jnp.max(jnp.abs(out - ref)))

    # --- bn=True (eval-mode fold), relu=False -------------------------------------------------
    gamma = 1.0 + 0.1 * jax.random.normal(kg, (Cout,), dtype=jnp.float32)
    beta = 0.1 * jax.random.normal(kb, (Cout,), dtype=jnp.float32)
    rmean = 0.1 * jax.random.normal(km, (Cout,), dtype=jnp.float32)
    rvar = jax.random.uniform(kv, (Cout,), dtype=jnp.float32, minval=0.5, maxval=1.5)
    out_bn = conv_block(x, w, bn=True, relu=False, gamma=gamma, beta=beta,
                        running_mean=rmean, running_var=rvar)
    out_bn = jax.block_until_ready(out_bn)

    scale = gamma / jnp.sqrt(rvar + 1e-5)
    ref_bn = jax.lax.conv_general_dilated(
        x.astype(jnp.bfloat16), (w * scale[:, None, None, None]).astype(jnp.bfloat16),
        window_strides=(1, 1), padding=((1, 1), (1, 1)),
        dimension_numbers=("NCHW", "OIHW", "NCHW"),
        preferred_element_type=jnp.float32)
    ref_bn = (ref_bn + (beta - rmean * scale)[None, :, None, None]).astype(out_bn.dtype)
    assert jnp.allclose(out_bn, ref_bn, atol=2e-2, rtol=2e-2), \
        float(jnp.max(jnp.abs(out_bn - ref_bn)))

    print("KERNEL_OK")
</pallas_src>

<mosaic_0001>
module attributes {stable_mosaic.version = 11 : i64} {
  func.func @_convblock_kernel(%arg0: i32, %arg1: i32, %arg2: memref<1x4x512xbf16, #tpu.memory_space<vmem>>, %arg3: memref<1x4x256xbf16, #tpu.memory_space<vmem>>, %arg4: memref<9x8x4xbf16, #tpu.memory_space<vmem>>, %arg5: memref<8x1xf32, #tpu.memory_space<vmem>>, %arg6: memref<1x8x512xf32, #tpu.memory_space<vmem>>) attributes {dimension_semantics = [#tpu.dimension_semantics<parallel>, #tpu.dimension_semantics<parallel>], iteration_bounds = array<i64: 2, 1>, scalar_prefetch = 0 : i64, scratch_operands = 0 : i64, tpu.core_type = #tpu.core_type<tc>, window_params = [{transform_indices = @transform_0, window_bounds = array<i64: 1, 4, 512>}, {transform_indices = @transform_1, window_bounds = array<i64: 1, 4, 256>}, {pipeline_mode = #tpu.pipeline_mode<synchronous>, transform_indices = @transform_2, window_bounds = array<i64: 9, 8, 4>}, {pipeline_mode = #tpu.pipeline_mode<synchronous>, transform_indices = @transform_3, window_bounds = array<i64: 8, 1>}, {transform_indices = @transform_4, window_bounds = array<i64: 1, 8, 512>}]} {
    %c0 = arith.constant 0 : index
    %c0_0 = arith.constant 0 : index
    %c0_1 = arith.constant 0 : index
    %0 = vector.load %arg2[%c0, %c0_0, %c0_1] : memref<1x4x512xbf16, #tpu.memory_space<vmem>>, vector<1x4x512xbf16>
    %1 = vector.shape_cast %0 : vector<1x4x512xbf16> to vector<4x512xbf16>
    %c0_2 = arith.constant 0 : index
    %c0_3 = arith.constant 0 : index
    %c0_4 = arith.constant 0 : index
    %2 = vector.load %arg3[%c0_2, %c0_3, %c0_4] : memref<1x4x256xbf16, #tpu.memory_space<vmem>>, vector<1x4x256xbf16>
    %3 = vector.shape_cast %2 : vector<1x4x256xbf16> to vector<4x256xbf16>
    %4 = tpu.concatenate %1, %3 in 1 : vector<4x512xbf16>, vector<4x256xbf16> -> vector<4x768xbf16>
    %5 = vector.extract_strided_slice %4 {offsets = [0, 0], sizes = [4, 512], strides = [1, 1]} : vector<4x768xbf16> to vector<4x512xbf16>
    %c0_5 = arith.constant 0 : index
    %c0_6 = arith.constant 0 : index
    %c0_7 = arith.constant 0 : index
    %6 = vector.load %arg4[%c0_5, %c0_6, %c0_7] : memref<9x8x4xbf16, #tpu.memory_space<vmem>>, vector<1x8x4xbf16>
    %7 = vector.shape_cast %6 : vector<1x8x4xbf16> to vector<8x4xbf16>
    %cst = arith.constant dense<0.000000e+00> : vector<8x512xf32>
    %8 = tpu.matmul %7, %5, %cst {dimension_numbers = #tpu.dot_dimension_numbers<[1], [0], [0], [1], [0, 0, 1, 1], [], []>} : vector<8x4xbf16>, vector<4x512xbf16>, vector<8x512xf32> -> vector<8x512xf32>
    %9 = vector.extract_strided_slice %4 {offsets = [0, 1], sizes = [4, 512], strides = [1, 1]} : vector<4x768xbf16> to vector<4x512xbf16>
    %c1 = arith.constant 1 : index
    %c0_8 = arith.constant 0 : index
    %c0_9 = arith.constant 0 : index
    %10 = vector.load %arg4[%c1, %c0_8, %c0_9] : memref<9x8x4xbf16, #tpu.memory_space<vmem>>, vector<1x8x4xbf16>
    %11 = vector.shape_cast %10 : vector<1x8x4xbf16> to vector<8x4xbf16>
    %cst_10 = arith.constant dense<0.000000e+00> : vector<8x512xf32>
    %12 = tpu.matmul %11, %9, %cst_10 {dimension_numbers = #tpu.dot_dimension_numbers<[1], [0], [0], [1], [0, 0, 1, 1], [], []>} : vector<8x4xbf16>, vector<4x512xbf16>, vector<8x512xf32> -> vector<8x512xf32>
    %13 = arith.addf %8, %12 : vector<8x512xf32>
    %14 = vector.extract_strided_slice %4 {offsets = [0, 2], sizes = [4, 512], strides = [1, 1]} : vector<4x768xbf16> to vector<4x512xbf16>
    %c2 = arith.constant 2 : index
    %c0_11 = arith.constant 0 : index
    %c0_12 = arith.constant 0 : index
    %15 = vector.load %arg4[%c2, %c0_11, %c0_12] : memref<9x8x4xbf16, #tpu.memory_space<vmem>>, vector<1x8x4xbf16>
    %16 = vector.shape_cast %15 : vector<1x8x4xbf16> to vector<8x4xbf16>
    %cst_13 = arith.constant dense<0.000000e+00> : vector<8x512xf32>
    %17 = tpu.matmul %16, %14, %cst_13 {dimension_numbers = #tpu.dot_dimension_numbers<[1], [0], [0], [1], [0, 0, 1, 1], [], []>} : vector<8x4xbf16>, vector<4x512xbf16>, vector<8x512xf32> -> vector<8x512xf32>
    %18 = arith.addf %13, %17 : vector<8x512xf32>
    %19 = vector.extract_strided_slice %4 {offsets = [0, 32], sizes = [4, 512], strides = [1, 1]} : vector<4x768xbf16> to vector<4x512xbf16>
    %c3 = arith.constant 3 : index
    %c0_14 = arith.constant 0 : index
    %c0_15 = arith.constant 0 : index
    %20 = vector.load %arg4[%c3, %c0_14, %c0_15] : memref<9x8x4xbf16, #tpu.memory_space<vmem>>, vector<1x8x4xbf16>
    %21 = vector.shape_cast %20 : vector<1x8x4xbf16> to vector<8x4xbf16>
    %cst_16 = arith.constant dense<0.000000e+00> : vector<8x512xf32>
    %22 = tpu.matmul %21, %19, %cst_16 {dimension_numbers = #tpu.dot_dimension_numbers<[1], [0], [0], [1], [0, 0, 1, 1], [], []>} : vector<8x4xbf16>, vector<4x512xbf16>, vector<8x512xf32> -> vector<8x512xf32>
    %23 = arith.addf %18, %22 : vector<8x512xf32>
    %24 = vector.extract_strided_slice %4 {offsets = [0, 33], sizes = [4, 512], strides = [1, 1]} : vector<4x768xbf16> to vector<4x512xbf16>
    %c4 = arith.constant 4 : index
    %c0_17 = arith.constant 0 : index
    %c0_18 = arith.constant 0 : index
    %25 = vector.load %arg4[%c4, %c0_17, %c0_18] : memref<9x8x4xbf16, #tpu.memory_space<vmem>>, vector<1x8x4xbf16>
    %26 = vector.shape_cast %25 : vector<1x8x4xbf16> to vector<8x4xbf16>
    %cst_19 = arith.constant dense<0.000000e+00> : vector<8x512xf32>
    %27 = tpu.matmul %26, %24, %cst_19 {dimension_numbers = #tpu.dot_dimension_numbers<[1], [0], [0], [1], [0, 0, 1, 1], [], []>} : vector<8x4xbf16>, vector<4x512xbf16>, vector<8x512xf32> -> vector<8x512xf32>
    %28 = arith.addf %23, %27 : vector<8x512xf32>
    %29 = vector.extract_strided_slice %4 {offsets = [0, 34], sizes = [4, 512], strides = [1, 1]} : vector<4x768xbf16> to vector<4x512xbf16>
    %c5 = arith.constant 5 : index
    %c0_20 = arith.constant 0 : index
    %c0_21 = arith.constant 0 : index
    %30 = vector.load %arg4[%c5, %c0_20, %c0_21] : memref<9x8x4xbf16, #tpu.memory_space<vmem>>, vector<1x8x4xbf16>
    %31 = vector.shape_cast %30 : vector<1x8x4xbf16> to vector<8x4xbf16>
    %cst_22 = arith.constant dense<0.000000e+00> : vector<8x512xf32>
    %32 = tpu.matmul %31, %29, %cst_22 {dimension_numbers = #tpu.dot_dimension_numbers<[1], [0], [0], [1], [0, 0, 1, 1], [], []>} : vector<8x4xbf16>, vector<4x512xbf16>, vector<8x512xf32> -> vector<8x512xf32>
    %33 = arith.addf %28, %32 : vector<8x512xf32>
    %34 = vector.extract_strided_slice %4 {offsets = [0, 64], sizes = [4, 512], strides = [1, 1]} : vector<4x768xbf16> to vector<4x512xbf16>
    %c6 = arith.constant 6 : index
    %c0_23 = arith.constant 0 : index
    %c0_24 = arith.constant 0 : index
    %35 = vector.load %arg4[%c6, %c0_23, %c0_24] : memref<9x8x4xbf16, #tpu.memory_space<vmem>>, vector<1x8x4xbf16>
    %36 = vector.shape_cast %35 : vector<1x8x4xbf16> to vector<8x4xbf16>
    %cst_25 = arith.constant dense<0.000000e+00> : vector<8x512xf32>
    %37 = tpu.matmul %36, %34, %cst_25 {dimension_numbers = #tpu.dot_dimension_numbers<[1], [0], [0], [1], [0, 0, 1, 1], [], []>} : vector<8x4xbf16>, vector<4x512xbf16>, vector<8x512xf32> -> vector<8x512xf32>
    %38 = arith.addf %33, %37 : vector<8x512xf32>
    %39 = vector.extract_strided_slice %4 {offsets = [0, 65], sizes = [4, 512], strides = [1, 1]} : vector<4x768xbf16> to vector<4x512xbf16>
    %c7 = arith.constant 7 : index
    %c0_26 = arith.constant 0 : index
    %c0_27 = arith.constant 0 : index
    %40 = vector.load %arg4[%c7, %c0_26, %c0_27] : memref<9x8x4xbf16, #tpu.memory_space<vmem>>, vector<1x8x4xbf16>
    %41 = vector.shape_cast %40 : vector<1x8x4xbf16> to vector<8x4xbf16>
    %cst_28 = arith.constant dense<0.000000e+00> : vector<8x512xf32>
    %42 = tpu.matmul %41, %39, %cst_28 {dimension_numbers = #tpu.dot_dimension_numbers<[1], [0], [0], [1], [0, 0, 1, 1], [], []>} : vector<8x4xbf16>, vector<4x512xbf16>, vector<8x512xf32> -> vector<8x512xf32>
    %43 = arith.addf %38, %42 : vector<8x512xf32>
    %44 = vector.extract_strided_slice %4 {offsets = [0, 66], sizes = [4, 512], strides = [1, 1]} : vector<4x768xbf16> to vector<4x512xbf16>
    %c8 = arith.constant 8 : index
    %c0_29 = arith.constant 0 : index
    %c0_30 = arith.constant 0 : index
    %45 = vector.load %arg4[%c8, %c0_29, %c0_30] : memref<9x8x4xbf16, #tpu.memory_space<vmem>>, vector<1x8x4xbf16>
    %46 = vector.shape_cast %45 : vector<1x8x4xbf16> to vector<8x4xbf16>
    %cst_31 = arith.constant dense<0.000000e+00> : vector<8x512xf32>
    %47 = tpu.matmul %46, %44, %cst_31 {dimension_numbers = #tpu.dot_dimension_numbers<[1], [0], [0], [1], [0, 0, 1, 1], [], []>} : vector<8x4xbf16>, vector<4x512xbf16>, vector<8x512xf32> -> vector<8x512xf32>
    %48 = arith.addf %43, %47 : vector<8x512xf32>
    %c0_32 = arith.constant 0 : index
    %c0_33 = arith.constant 0 : index
    %49 = vector.load %arg5[%c0_32, %c0_33] : memref<8x1xf32, #tpu.memory_space<vmem>>, vector<8x1xf32>
    %50 = vector.broadcast %49 : vector<8x1xf32> to vector<8x512xf32>
    %51 = arith.addf %48, %50 : vector<8x512xf32>
    %cst_34 = arith.constant 0.000000e+00 : f32
    %52 = vector.broadcast %cst_34 : f32 to vector<8x512xf32>
    %53 = arith.maximumf %51, %52 : vector<8x512xf32>
    %54 = vector.shape_cast %53 : vector<8x512xf32> to vector<1x8x512xf32>
    %c0_35 = arith.constant 0 : index
    %c0_36 = arith.constant 0 : index
    %c0_37 = arith.constant 0 : index
    %55 = vector.load %arg6[%c0_35, %c0_36, %c0_37] : memref<1x8x512xf32, #tpu.memory_space<vmem>>, vector<1x8x512xf32>
    tpu.vector_store %arg6[%c0_35, %c0_36, %c0_37], %54 {strides = array<i32>} : memref<1x8x512xf32, #tpu.memory_space<vmem>>, vector<1x8x512xf32>,
    return
  }
  func.func @transform_0(%arg0: i32, %arg1: i32) -> (i32, i32, i32) {
    %c0_i32 = arith.constant 0 : i32
    %c0_i32_0 = arith.constant 0 : i32
    return %arg0, %c0_i32, %arg1 : i32, i32, i32
  }
  func.func @transform_1(%arg0: i32, %arg1: i32) -> (i32, i32, i32) {
    %c1_i32 = arith.constant 1 : i32
    %0 = arith.addi %arg1, %c1_i32 : i32
    %c2_i32 = arith.constant 2 : i32
    %1 = arith.muli %0, %c2_i32 : i32
    %c0_i32 = arith.constant 0 : i32
    %c0_i32_0 = arith.constant 0 : i32
    return %arg0, %c0_i32, %1 : i32, i32, i32
  }
  func.func @transform_2(%arg0: i32, %arg1: i32) -> (i32, i32, i32) {
    %c0_i32 = arith.constant 0 : i32
    %c0_i32_0 = arith.constant 0 : i32
    %c0_i32_1 = arith.constant 0 : i32
    %c0_i32_2 = arith.constant 0 : i32
    return %c0_i32, %c0_i32_0, %c0_i32_1 : i32, i32, i32
  }
  func.func @transform_3(%arg0: i32, %arg1: i32) -> (i32, i32) {
    %c0_i32 = arith.constant 0 : i32
    %c0_i32_0 = arith.constant 0 : i32
    %c0_i32_1 = arith.constant 0 : i32
    return %c0_i32, %c0_i32_0 : i32, i32
  }
  func.func @transform_4(%arg0: i32, %arg1: i32) -> (i32, i32, i32) {
    %c0_i32 = arith.constant 0 : i32
    %c0_i32_0 = arith.constant 0 : i32
    return %arg0, %c0_i32, %arg1 : i32, i32, i32
  }
}

</mosaic_0001>

<bundles_post_ra>
// kernel: tpu_custom_call.1
= control target key start
LH: loop header
LB: loop body
LE: loop exit
PB: predicated region body
PF: predicated region fallthrough
CT: control target
= control target key end

     0   :  { %9 = vsyncpa [#allocation3], 0  ;;  %s2029_s0 = inlined_call_operand.vmem [shape: bf16[2,4,768], index: 0, kind: input, shape index: {}]   ;;  %s2030_s1 = inlined_call_operand.vmem [shape: bf16[2,4,768], index: 1, kind: input, shape index: {}]   ;;  %s2031_s2 = inlined_call_operand.vmem [shape: bf16[9,8,4], index: 2, kind: input, shape index: {}]   ;;  %s2032_s3 = inlined_call_operand.vmem [shape: f32[8,1], index: 3, kind: input, shape index: {}]   ;;  %s2033_s4 = inlined_call_operand.hbm [shape: f32[2,8,512], index: 4, kind: output, shape index: {}]  }
   0x1   :  { %11 = vsyncpa [#allocation3 + $0x1], 0  ;;  %s1740_s15 = smov 0   ;;  %s1742_s16 = smov 0  }
   0x2   :  { %s1744_s17 = smov 0   ;;  %s1746_s18 = smov 0  }
   0x3   :  { %s1748_s19 = smov 0   ;;  %s1750_s20 = smov 0  }
   0x4 LB: > { %s1495_s21 = sadd.s32 4294967295, %s1702_s20   ;;  %s1496_s22 = sadd.s32 4294967294, %s1702_s20   ;;  %s1702_s20 = sphi %s1750_s20, %s17_s20   ;;  %s1698_s19 = sphi %s1748_s19, %s2040_s19   ;;  %s1694_s18 = sphi %s1746_s18, %s2039_s18   ;;  %s1690_s17 = sphi %s1744_s17, %s2038_s17   ;;  %s1686_s16 = sphi %s1742_s16, %s2037_s16   ;;  %s1682_s15 = sphi %s1740_s15, %s2036_s15  }
   0x5   : > { %s29_s23 = sadd.s32 1, %s1698_s19  ;;  %s140_s24 = sadd.s32 1, %s1690_s17 }
   0x6   : > { %p31_p0 = scmp.ge.s32.totalorder %s29_s23, 2  ;;  %p150_p1 = scmp.ne.s32.totalorder %s1690_s17, %s1686_s16 }
   0x7   : > { %p151_p2 = scmp.eq.s32.totalorder %s1495_s21, 1  ;;  %p156_p3 = scmp.ne.s32.totalorder %s1686_s16, %s1682_s15 }
   0x8   : > { %s2042_s23 = smov (%p31_p0, %s29_s23), 0  ;;  %p157_p5 = scmp.eq.s32.totalorder %s1496_s22, 1 }
   0x9   : > { %p1780_p4 = por %p151_p2, %p150_p1  ;;  %s135_s26 = ssub.s32 %s1698_s19, %s2042_s23 }
   0xa   : > { %p1499_p6 = scmp.ge.s32.totalorder %s1702_s20, 1  ;;  %p138_p7 = scmp.eq.s32.totalorder %s135_s26, 0 }
   0xb   : > { %p1787_p8 = por %p157_p5, %p156_p3  ;;  %p219_p9 = scmp.lt.s32.totalorder %s1702_s20, 3 }
   0xc   : > { %s1793_s28 = scalar_select %p138_p7, %s1690_s17, %s140_s24  }
   0xd   : > { %p220_p10 = pnand %p1499_p6, %p219_p9 }
   0xe   : > { %p269_p11 = scmp.lt.s32.totalorder (!%p220_p10), %s1694_s18, 1  ;;  %s1706_s12 = smov (!%p220_p10), 127  }
   0xf   : > { %223 = sbr.rel (%p220_p10) target bundleno = 439 (0x1b7), region = 36  ;;  %s1707_s13 = smov (!%p220_p10), 126  }
  0x10   : > { %s1708_s14 = smov (!%p220_p10), 96   ;;  %s1709_s21 = smov (!%p220_p10), 95  }
  0x11   : > { %s1710_s22 = smov (!%p220_p10), 94   ;;  %s1711_s24 = smov (!%p220_p10), 64  }
  0x12   : > { %s1712_s26 = smov (!%p220_p10), 63  }
  0x14   : > { %v305_v0 = vlaneseq  ;;  %v1704_v1 = vmov 1983009808   ;;  %s270_s29 = scalar_select %p269_p11, %s1694_s18, 1  ;;  %v1705_v10 = vmov 0   ;;  %v1366_v14 = vld [vmem:[%s2032_s3] sm:$0xff]  ;;  %vm339_vm0 = vcmask 1039360  }
  0x15   : > { %v303_v2 = vunpack.c.l.s4 %v1704_v1  ;;  %393 = vmatprep.mubr.bf16.mxu0 %v1705_v10  ;;  %434 = vmatprep.mubr.bf16.mxu1 %v1705_v10  ;;  %vm348_vm1 = vcmask 1041408   ;;  %v1504_v24 = vld [vmem:[%s2031_s2 + $0x4] sm:$0xf]  ;;  %vm344_vm2 = vcmask 31744   ;;  %vm552_vm3 = vcmask 1031168  }
  0x16   : > { %v306_v3 = vshrl.u32 %v305_v0, 7  ;;  %s1556_s30 = smul.u32 12, %s270_s29  ;;  %1624 = vset.pattern.permute.xlu0 %v1705_v10  ;;  %s1713_s29 = smov 62   ;;  %v326_v36 = vld [vmem:[%s2031_s2] sm:$0xf]  ;;  %vm670_vm4 = vcmask 785408  }
  0x17   : > { %v304_v4 = vunpack.c.0.s8 %v303_v2  ;;  %v1513_v47 = vld [vmem:[%s2031_s2 + $0x8] sm:$0xf]  ;;  %vm788_vm5 = vcmask 777216   ;;  %v1518_v58 = vld [vmem:[%s2031_s2 + $0xc] sm:$0xf]  ;;  %vm906_vm6 = vcmask 769024  }
  0x18   : > { %s1554_s5 = sadd.s32 8, %s1556_s30  ;;  %s276_s8 = scalar_lea.vmem %s2029_s0, %s1556_s30  ;;  %vm1024_vm7 = vcmask 523264   ;;  %vm1142_vm8 = vcmask 515072   ;;  %vm1260_vm9 = vcmask 506880  }
  0x19   : > { %v307_v5 = vsub.s32 %v304_v4, %v306_v3  ;;  %s292_s11 = scalar_lea.vmem %s2030_s1, %s1554_s5  ;;  %v298_v6 = vld [vmem:[%s276_s8] sm:$0xff]  ;;  %v1523_v4 = vld [vmem:[%s2031_s2 + $0x10] sm:$0xf]  ;;  %s261_s8 = sand.u32 1, %s1686_s16  }
  0x1a   : > { %v1503_v7 = vld.sshfl [vmem:[%s292_s11] sm:$0x33 pattern:$0x76325410]  ;;  %v301_v8 = vcombine.high %v298_v6, %v298_v6  ;;  %s1500_s9 = sshll.u32 %s261_s8, 5  ;;  %s1555_s11 = sshll.u32 %s1694_s18, 9 }
  0x1b   : > { %v1803_v9 = vrot.slane %v298_v6, %v307_v5  ;;  %337 = vrot.lane.b32.xlu0 %v1503_v7, %s1706_s12  ;;  %s263_s10 = scalar_lea.vmem [#allocation2], %s1500_s9  ;;  %s1714_s18 = smov [#allocation2]  }
  0x1c   : > { %v1807_v11 = vrot.slane %v301_v8, %v307_v5 }
  0x1d   : > { %542 = vrot.lane.b32.xlu1 %v1803_v9, %s1707_s13  ;;  %v1814_v12 = vcombine.high %v1803_v9, %v1803_v9  ;;  %v447_v26 = vsel %vm348_vm1, %v1803_v9, 0 }
  0x1e   : > { %v1821_v13 = vcombine.high %v1807_v11, %v1807_v11  ;;  %v453_v34 = vsel %vm348_vm1, %v1807_v11, 0 }
  0x1f   : > { %329 = vrot.lane.b32.xlu0 %v1803_v9, %s1706_s12 }
  0x21   : > { %333 = vrot.lane.b32.xlu1 %v1807_v11, %s1706_s12 }
  0x23   : > { %331 = vrot.lane.b32.xlu0 %v1814_v12, %s1706_s12 }
  0x25   : > { %546 = vrot.lane.b32.xlu1 %v1807_v11, %s1707_s13 }
  0x27   : > { %544 = vrot.lane.b32.xlu0 %v1814_v12, %s1707_s13 }
  0x29   : > { %335 = vrot.lane.b32.xlu1 %v1821_v13, %s1706_s12  ;;  %s1401_s12 = sshll.u32 %s263_s10, 4  ;;  %s1402_s12 = int_to_ptr.vmem [resolvable:$true] %s1401_s12 }
  0x2b   : > { %548 = vrot.lane.b32.xlu0 %v1821_v13, %s1707_s13 }
  0x2d   : > { %550 = vrot.lane.b32.xlu1 %v1503_v7, %s1707_s13 }
  0x2f   : > { %660 = vrot.lane.b32.xlu0 %v1803_v9, %s1708_s14 }
  0x31   : > { %662 = vrot.lane.b32.xlu1 %v1814_v12, %s1708_s14 }
  0x33   : > { %664 = vrot.lane.b32.xlu0 %v1807_v11, %s1708_s14 }
  0x35   : > { %666 = vrot.lane.b32.xlu1 %v1821_v13, %s1708_s14 }
  0x37   : > { %668 = vrot.lane.b32.xlu0 %v1503_v7, %s1708_s14 }
  0x39   : > { %778 = vrot.lane.b32.xlu1 %v1803_v9, %s1709_s21 }
  0x3b   : > { %780 = vrot.lane.b32.xlu0 %v1814_v12, %s1709_s21 }
  0x3d   : > { %782 = vrot.lane.b32.xlu1 %v1807_v11, %s1709_s21 }
  0x3f   : > { %784 = vrot.lane.b32.xlu0 %v1821_v13, %s1709_s21 }
  0x41   : > { %786 = vrot.lane.b32.xlu1 %v1503_v7, %s1709_s21  ;;  %s1399_s21 = scalar_lea.hbm %s2033_s4, %s1555_s11 }
  0x43   : > { %896 = vrot.lane.b32.xlu0 %v1803_v9, %s1710_s22 }
  0x45   : > { %898 = vrot.lane.b32.xlu1 %v1814_v12, %s1710_s22 }
  0x47   : > { %900 = vrot.lane.b32.xlu0 %v1807_v11, %s1710_s22 }
  0x49   : > { %902 = vrot.lane.b32.xlu1 %v1821_v13, %s1710_s22 }
  0x4b   : > { %904 = vrot.lane.b32.xlu0 %v1503_v7, %s1710_s22  ;;  %s1385_s22 = scalar_lea.sflag [#allocation3], %s261_s8 }
  0x4d   : > { %1014 = vrot.lane.b32.xlu1 %v1803_v9, %s1711_s24 }
  0x4f   : > { %1016 = vrot.lane.b32.xlu0 %v1814_v12, %s1711_s24 }
  0x51   : > { %1018 = vrot.lane.b32.xlu1 %v1807_v11, %s1711_s24 }
  0x53   : > { %1020 = vrot.lane.b32.xlu0 %v1821_v13, %s1711_s24 }
  0x55   : > { %1022 = vrot.lane.b32.xlu1 %v1503_v7, %s1711_s24  ;;  %s1626_s24 = scalar_lea.vmem %s1402_s12, 512 }
  0x56   : > { %p1627_p12 = scmp.ne.s32.totalorder %s1402_s12, %s1626_s24 }
  0x57   : > { %1132 = vrot.lane.b32.xlu0 %v1803_v9, %s1712_s26 }
  0x58   : > { %p1628_p13 = pnand %p1627_p12, %p1780_p4 }
  0x59   : > { %1134 = vrot.lane.b32.xlu1 %v1814_v12, %s1712_s26 }
  0x5a   : > { %p1629_p0 = pneg %p1628_p13 }
  0x5b   : > { %1136 = vrot.lane.b32.xlu0 %v1807_v11, %s1712_s26 }
  0x5d   : > { %1138 = vrot.lane.b32.xlu1 %v1821_v13, %s1712_s26 }
  0x5f   : > { %1140 = vrot.lane.b32.xlu0 %v1503_v7, %s1712_s26  ;;  %s1630_s26 = sshll.u32 %s1714_s18, 4  ;;  %s1631_s26 = int_to_ptr.vmem [resolvable:$false] %s1630_s26 }
  0x60   : > { %p1633_p1 = scmp.lt.s32.totalorder %s1402_s12, %s1631_s26 }
  0x61   : > { %1250 = vrot.lane.b32.xlu1 %v1803_v9, %s1713_s29 }
  0x63   : > { %1252 = vrot.lane.b32.xlu0 %v1814_v12, %s1713_s29 }
  0x65   : > { %1254 = vrot.lane.b32.xlu1 %v1807_v11, %s1713_s29 }
  0x67   : > { %1256 = vrot.lane.b32.xlu0 %v1821_v13, %s1713_s29 }
  0x69   : > { %1258 = vrot.lane.b32.xlu1 %v1503_v7, %s1713_s29  ;;  %s1632_s29 = scalar_lea.vmem %s1631_s26, 1024 }
  0x6a   : > { %p1634_p2 = scmp.lt.s32.totalorder %s1632_s29, %s1626_s24 }
  0x6b   : > { %1369 = vperm.xlu0 %1624, %v1366_v14  }
  0x6c   : > { %p1635_p3 = por %p1634_p2, %p1633_p1 }
  0x6e   : > { %p1636_p5 = pnand %p1635_p3, %p1629_p0 }
  0x8d   : > { %v338_v15 = vpop.permute.xlu0 %337 }
  0x8f   : > { %v543_v16 = vpop.permute.xlu1 %542 }
  0x91   : > { %v330_v17 = vpop.permute.xlu0 %329 }
  0x93   : > { %v334_v18 = vpop.permute.xlu1 %333 }
  0x95   : > { %v332_v19 = vpop.permute.xlu0 %331 }
  0x96   : > { %v341_v21 = vsel %vm339_vm0, %v332_v19, %v334_v18  ;;  %v340_v22 = vsel %vm339_vm0, %v330_v17, %v332_v19 }
  0x97   : > { %v547_v20 = vpop.permute.xlu1 %546  ;;  %1505 = vmatprep.subr.msk.bf16.mxu0 %vm348_vm1, %v341_v21  ;;  %v350_v23 = vsel %vm348_vm1, %v340_v22, 0 }
  0x98   : > { %376 = vmatpush1.bf16.msra.mxu0 %v350_v23 }
  0x99   : > { %v545_v25 = vpop.permute.xlu0 %544  ;;  %1509 = vmatprep.subr.msk.bf16.mxu0 %vm348_vm1, %v1814_v12 }
  0x9a   : > { %v554_v30 = vsel %vm552_vm3, %v545_v25, %v547_v20  ;;  %v553_v35 = vsel %vm552_vm3, %v543_v16, %v545_v25 }
  0x9b   : > { %v336_v27 = vpop.permute.xlu1 %335  ;;  %1506 = vmatmul.mubr.msk.bf16.vlgmr.msra.gmra.mxu0 %vm344_vm2, %v1504_v24  ;;  %v561_v40 = vsel %vm348_vm1, %v553_v35, 0  ;;  %v1538_v35 = vld [vmem:[%s2031_s2 + $0x1c] sm:$0xf] }
  0x9c   : > { %v343_v28 = vsel %vm339_vm0, %v336_v27, %v338_v15  ;;  %v342_v29 = vsel %vm339_vm0, %v334_v18, %v336_v27  ;;  %473 = vmatpush1.bf16.msra.mxu0 %v447_v26  ;;  %490 = vmatprep.mubr.bf16.mxu0 %v1705_v10  ;;  %v1528_v15 = vld [vmem:[%s2031_s2 + $0x14] sm:$0xf]  ;;  %v1533_v26 = vld [vmem:[%s2031_s2 + $0x18] sm:$0xf] }
  0x9d   : > { %1507 = vmatprep.subr.msk.bf16.mxu1 %vm348_vm1, %v343_v28  ;;  %v356_v31 = vsel %vm348_vm1, %v342_v29, 0  ;;  %1514 = vmatprep.subr.msk.bf16.mxu0 %vm348_vm1, %v554_v30  ;;  %v549_v32 = vpop.permute.xlu0 %548 }
  0x9e   : > { %417 = vmatpush1.bf16.msra.mxu1 %v356_v31  ;;  %v555_v41 = vsel %vm552_vm3, %v547_v20, %v549_v32 }
  0x9f   : > { %v551_v33 = vpop.permute.xlu1 %550  ;;  %1511 = vmatprep.subr.msk.bf16.mxu1 %vm348_vm1, %v1821_v13  ;;  %v567_v45 = vsel %vm348_vm1, %v555_v41, 0 }
  0xa0   : > { %v556_v37 = vsel %vm552_vm3, %v549_v32, %v551_v33 }
  0xa1   : > { %1508 = vmatmul.mubr.msk.bf16.vlgmr.msra.gmra.mxu1 %vm344_vm2, %v1504_v24  ;;  %v661_v38 = vpop.permute.xlu0 %660 }
  0xa2   : > { %514 = vmatpush1.bf16.msra.mxu1 %v453_v34  ;;  %531 = vmatprep.mubr.bf16.mxu1 %v1705_v10 }
  0xa3   : > { %1516 = vmatprep.subr.msk.bf16.mxu1 %vm348_vm1, %v556_v37  ;;  %v663_v39 = vpop.permute.xlu1 %662  ;;  %1510 = vmatmul.mubr.msk.bf16.vlgmr.msra.gmra.mxu0 %vm344_vm2, %v326_v36 }
  0xa4   : > { %587 = vmatpush1.bf16.msra.mxu0 %v561_v40  ;;  %604 = vmatprep.mubr.bf16.mxu0 %v1705_v10  ;;  %v671_v46 = vsel %vm670_vm4, %v661_v38, %v663_v39 }
  0xa5   : > { %v665_v42 = vpop.permute.xlu0 %664  ;;  %v679_v51 = vsel %vm348_vm1, %v671_v46, 0  ;;  %v1543_v46 = vld [vmem:[%s2031_s2 + $0x20] sm:$0xf] }
  0xa6   : > { %v672_v43 = vsel %vm670_vm4, %v663_v39, %v665_v42 }
  0xa7   : > { %v667_v44 = vpop.permute.xlu1 %666  ;;  %1519 = vmatprep.subr.msk.bf16.mxu0 %vm348_vm1, %v672_v43 }
  0xa8   : > { %v673_v52 = vsel %vm670_vm4, %v665_v42, %v667_v44 }
  0xa9   : > { %1512 = vmatmul.mubr.msk.bf16.vlgmr.msra.gmra.mxu1 %vm344_vm2, %v326_v36  ;;  %v669_v48 = vpop.permute.xlu0 %668  ;;  %v685_v56 = vsel %vm348_vm1, %v673_v52, 0 }
  0xaa   : > { %628 = vmatpush1.bf16.msra.mxu1 %v567_v45  ;;  %645 = vmatprep.mubr.bf16.mxu1 %v1705_v10  ;;  %v674_v49 = vsel %vm670_vm4, %v667_v44, %v669_v48 }
  0xab   : > { %v779_v50 = vpop.permute.xlu1 %778  ;;  %1515 = vmatmul.mubr.msk.bf16.vlgmr.msra.gmra.mxu0 %vm344_vm2, %v1513_v47  ;;  %1521 = vmatprep.subr.msk.bf16.mxu1 %vm348_vm1, %v674_v49 }
  0xac   : > { %705 = vmatpush1.bf16.msra.mxu0 %v679_v51  ;;  %722 = vmatprep.mubr.bf16.mxu0 %v1705_v10 }
  0xad   : > { %v781_v53 = vpop.permute.xlu0 %780 }
  0xae   : > { %v789_v57 = vsel %vm788_vm5, %v779_v50, %v781_v53 }
  0xaf   : > { %v783_v54 = vpop.permute.xlu1 %782  ;;  %v797_v61 = vsel %vm348_vm1, %v789_v57, 0 }
  0xb0   : > { %v790_v55 = vsel %vm788_vm5, %v781_v53, %v783_v54 }
  0xb1   : > { %1517 = vmatmul.mubr.msk.bf16.vlgmr.msra.gmra.mxu1 %vm344_vm2, %v1513_v47  ;;  %1524 = vmatprep.subr.msk.bf16.mxu0 %vm348_vm1, %v790_v55  ;;  %v785_v59 = vpop.permute.xlu0 %784 }
  0xb2   : > { %746 = vmatpush1.bf16.msra.mxu1 %v685_v56  ;;  %763 = vmatprep.mubr.bf16.mxu1 %v1705_v10  ;;  %v791_v63 = vsel %vm788_vm5, %v783_v54, %v785_v59 }
  0xb3   : > { %v787_v60 = vpop.permute.xlu1 %786  ;;  %1520 = vmatmul.mubr.msk.bf16.vlgmr.msra.gmra.mxu0 %vm344_vm2, %v1518_v58  ;;  %v803_v2 = vsel %vm348_vm1, %v791_v63, 0 }
  0xb4   : > { %v792_v62 = vsel %vm788_vm5, %v785_v59, %v787_v60  ;;  %823 = vmatpush1.bf16.msra.mxu0 %v797_v61  ;;  %840 = vmatprep.mubr.bf16.mxu0 %v1705_v10 }
  0xb5   : > { %1526 = vmatprep.subr.msk.bf16.mxu1 %vm348_vm1, %v792_v62  ;;  %v897_v0 = vpop.permute.xlu0 %896 }
  0xb7   : > { %v899_v1 = vpop.permute.xlu1 %898 }
  0xb8   : > { %v907_v3 = vsel %vm906_vm6, %v897_v0, %v899_v1 }
  0xb9   : > { %1522 = vmatmul.mubr.msk.bf16.vlgmr.msra.gmra.mxu1 %vm344_vm2, %v1518_v58  ;;  %v901_v5 = vpop.permute.xlu0 %900  ;;  %v915_v8 = vsel %vm348_vm1, %v907_v3, 0 }
  0xba   : > { %864 = vmatpush1.bf16.msra.mxu1 %v803_v2  ;;  %881 = vmatprep.mubr.bf16.mxu1 %v1705_v10  ;;  %v908_v6 = vsel %vm906_vm6, %v899_v1, %v901_v5 }
  0xbb   : > { %v903_v7 = vpop.permute.xlu1 %902  ;;  %1525 = vmatmul.mubr.msk.bf16.vlgmr.msra.gmra.mxu0 %vm344_vm2, %v1523_v4  ;;  %1529 = vmatprep.subr.msk.bf16.mxu0 %vm348_vm1, %v908_v6 }
  0xbc   : > { %941 = vmatpush1.bf16.msra.mxu0 %v915_v8  ;;  %958 = vmatprep.mubr.bf16.mxu0 %v1705_v10  ;;  %v909_v9 = vsel %vm906_vm6, %v901_v5, %v903_v7 }
  0xbd   : > { %v905_v11 = vpop.permute.xlu0 %904  ;;  %v921_v14 = vsel %vm348_vm1, %v909_v9, 0 }
  0xbe   : > { %v910_v12 = vsel %vm906_vm6, %v903_v7, %v905_v11 }
  0xbf   : > { %v1015_v13 = vpop.permute.xlu1 %1014  ;;  %1531 = vmatprep.subr.msk.bf16.mxu1 %vm348_vm1, %v910_v12 }
  0xc1   : > { %1527 = vmatmul.mubr.msk.bf16.vlgmr.msra.gmra.mxu1 %vm344_vm2, %v1523_v4  ;;  %v1017_v16 = vpop.permute.xlu0 %1016 }
  0xc2   : > { %982 = vmatpush1.bf16.msra.mxu1 %v921_v14  ;;  %999 = vmatprep.mubr.bf16.mxu1 %v1705_v10  ;;  %v1025_v17 = vsel %vm1024_vm7, %v1015_v13, %v1017_v16 }
  0xc3   : > { %v1019_v18 = vpop.permute.xlu1 %1018  ;;  %v1033_v19 = vsel %vm348_vm1, %v1025_v17, 0  ;;  %1530 = vmatmul.mubr.msk.bf16.vlgmr.msra.gmra.mxu0 %vm344_vm2, %v1528_v15 }
  0xc4   : > { %v1026_v20 = vsel %vm1024_vm7, %v1017_v16, %v1019_v18  ;;  %1076 = vmatprep.mubr.bf16.mxu0 %v1705_v10 }
  0xc5   : > { %1534 = vmatprep.subr.msk.bf16.mxu0 %vm348_vm1, %v1026_v20  ;;  %v1021_v21 = vpop.permute.xlu0 %1020 }
  0xc6   : > { %1059 = vmatpush1.bf16.msra.mxu0 %v1033_v19  ;;  %v1027_v22 = vsel %vm1024_vm7, %v1019_v18, %v1021_v21 }
  0xc7   : > { %v1023_v23 = vpop.permute.xlu1 %1022  ;;  %v1039_v24 = vsel %vm348_vm1, %v1027_v22, 0 }
  0xc8   : > { %v1028_v25 = vsel %vm1024_vm7, %v1021_v21, %v1023_v23 }
  0xc9   : > { %1532 = vmatmul.mubr.msk.bf16.vlgmr.msra.gmra.mxu1 %vm344_vm2, %v1528_v15  ;;  %1536 = vmatprep.subr.msk.bf16.mxu1 %vm348_vm1, %v1028_v25  ;;  %v1133_v27 = vpop.permute.xlu0 %1132 }
  0xca   : > { %1100 = vmatpush1.bf16.msra.mxu1 %v1039_v24  ;;  %1117 = vmatprep.mubr.bf16.mxu1 %v1705_v10 }
  0xcb   : > { %v1135_v28 = vpop.permute.xlu1 %1134  ;;  %1535 = vmatmul.mubr.msk.bf16.vlgmr.msra.gmra.mxu0 %vm344_vm2, %v1533_v26 }
  0xcc   : > { %v1143_v29 = vsel %vm1142_vm8, %v1133_v27, %v1135_v28  ;;  %1194 = vmatprep.mubr.bf16.mxu0 %v1705_v10 }
  0xcd   : > { %v1137_v30 = vpop.permute.xlu0 %1136  ;;  %v1151_v33 = vsel %vm348_vm1, %v1143_v29, 0 }
  0xce   : > { %v1144_v31 = vsel %vm1142_vm8, %v1135_v28, %v1137_v30 }
  0xcf   : > { %v1139_v32 = vpop.permute.xlu1 %1138  ;;  %1539 = vmatprep.subr.msk.bf16.mxu0 %vm348_vm1, %v1144_v31 }
  0xd0   : > { %v1145_v34 = vsel %vm1142_vm8, %v1137_v30, %v1139_v32  ;;  %1177 = vmatpush1.bf16.msra.mxu0 %v1151_v33 }
  0xd1   : > { %1537 = vmatmul.mubr.msk.bf16.vlgmr.msra.gmra.mxu1 %vm344_vm2, %v1533_v26  ;;  %v1141_v36 = vpop.permute.xlu0 %1140  ;;  %v1157_v39 = vsel %vm348_vm1, %v1145_v34, 0 }
  0xd2   : > { %1235 = vmatprep.mubr.bf16.mxu1 %v1705_v10  ;;  %v1146_v37 = vsel %vm1142_vm8, %v1139_v32, %v1141_v36 }
  0xd3   : > { %v1251_v38 = vpop.permute.xlu1 %1250  ;;  %1540 = vmatmul.mubr.msk.bf16.vlgmr.msra.gmra.mxu0 %vm344_vm2, %v1538_v35  ;;  %1541 = vmatprep.subr.msk.bf16.mxu1 %vm348_vm1, %v1146_v37 }
  0xd4   : > { %1218 = vmatpush1.bf16.msra.mxu1 %v1157_v39  ;;  %1312 = vmatprep.mubr.bf16.mxu0 %v1705_v10 }
  0xd5   : > { %v1253_v40 = vpop.permute.xlu0 %1252 }
  0xd6   : > { %v1261_v41 = vsel %vm1260_vm9, %v1251_v38, %v1253_v40 }
  0xd7   : > { %v1255_v42 = vpop.permute.xlu1 %1254  ;;  %v1269_v43 = vsel %vm348_vm1, %v1261_v41, 0 }
  0xd8   : > { %v1262_v44 = vsel %vm1260_vm9, %v1253_v40, %v1255_v42 }
  0xd9   : > { %1542 = vmatmul.mubr.msk.bf16.vlgmr.msra.gmra.mxu1 %vm344_vm2, %v1538_v35  ;;  %1544 = vmatprep.subr.msk.bf16.mxu0 %vm348_vm1, %v1262_v44  ;;  %v1257_v45 = vpop.permute.xlu0 %1256 }
  0xda   : > { %1295 = vmatpush1.bf16.msra.mxu0 %v1269_v43  ;;  %1353 = vmatprep.mubr.bf16.mxu1 %v1705_v10  ;;  %v1263_v47 = vsel %vm1260_vm9, %v1255_v42, %v1257_v45 }
  0xdb   : > { %v1259_v48 = vpop.permute.xlu1 %1258  ;;  %v1275_v49 = vsel %vm348_vm1, %v1263_v47, 0 }
  0xdc   : > { %v1264_v50 = vsel %vm1260_vm9, %v1257_v45, %v1259_v48 }
  0xdd   : > { %1545 = vmatmul.mubr.msk.bf16.vlgmr.msra.gmra.mxu0 %vm344_vm2, %v1543_v46  ;;  %1546 = vmatprep.subr.msk.bf16.mxu1 %vm348_vm1, %v1264_v50 }
  0xde   : > { %1336 = vmatpush1.bf16.msra.mxu1 %v1275_v49 }
  0xe1   : > { %1547 = vmatmul.mubr.msk.bf16.vlgmr.msra.gmra.mxu1 %vm344_vm2, %v1543_v46 }
 0x15b   : > { %v395_v51 = vpop.f32.mrf.mxu0 }
 0x15d   : > { %v397_v52 = vpop.f32.mrf.mxu0 }
 0x15f   : > { %v399_v53 = vpop.f32.mrf.mxu0 }
 0x161   : > { %v436_v54 = vpop.f32.mrf.mxu1  ;;  %v400_v55 = vpop.f32.mrf.mxu0 }
 0x163   : > { %v438_v10 = vpop.f32.mrf.mxu1  ;;  %v492_v56 = vpop.f32.mrf.mxu0 }
 0x164   : > { %v493_v37 = vadd.f32 %v492_v56, %v395_v51 }
 0x165   : > { %v440_v57 = vpop.f32.mrf.mxu1  ;;  %v494_v58 = vpop.f32.mrf.mxu0 }
 0x166   : > { %v495_v40 = vadd.f32 %v494_v58, %v397_v52 }
 0x167   : > { %v441_v59 = vpop.f32.mrf.mxu1  ;;  %v496_v60 = vpop.f32.mrf.mxu0 }
 0x169   : > { %v533_v61 = vpop.f32.mrf.mxu1  ;;  %v497_v62 = vpop.f32.mrf.mxu0 }
 0x16a   : > { %v534_v44 = vadd.f32 %v533_v61, %v436_v54 }
 0x16b   : > { %v535_v63 = vpop.f32.mrf.mxu1  ;;  %v606_v0 = vpop.f32.mrf.mxu0 }
 0x16c   : > { %v654_v41 = vadd.f32 %v606_v0, %v493_v37  ;;  %v536_v49 = vadd.f32 %v535_v63, %v438_v10 }
 0x16d   : > { %v537_v1 = vpop.f32.mrf.mxu1  ;;  %v608_v2 = vpop.f32.mrf.mxu0 }
 0x16e   : > { %v655_v45 = vadd.f32 %v608_v2, %v495_v40 }
 0x16f   : > { %v538_v3 = vpop.f32.mrf.mxu1  ;;  %v610_v4 = vpop.f32.mrf.mxu0 }
 0x171   : > { %v647_v5 = vpop.f32.mrf.mxu1  ;;  %v611_v6 = vpop.f32.mrf.mxu0 }
 0x172   : > { %v656_v50 = vadd.f32 %v647_v5, %v534_v44  ;;  %v1370_v6 = vpop.permute.xlu0 %1369 }
 0x173   : > { %v649_v7 = vpop.f32.mrf.mxu1  ;;  %v724_v8 = vpop.f32.mrf.mxu0 }
 0x174   : > { %v772_v46 = vadd.f32 %v724_v8, %v654_v41  ;;  %v657_v60 = vadd.f32 %v649_v7, %v536_v49 }
 0x175   : > { %v651_v9 = vpop.f32.mrf.mxu1  ;;  %v726_v11 = vpop.f32.mrf.mxu0 }
 0x176   : > { %v773_v53 = vadd.f32 %v726_v11, %v655_v45 }
 0x177   : > { %v652_v12 = vpop.f32.mrf.mxu1  ;;  %v728_v13 = vpop.f32.mrf.mxu0 }
 0x179   : > { %v765_v14 = vpop.f32.mrf.mxu1  ;;  %v729_v15 = vpop.f32.mrf.mxu0 }
 0x17a   : > { %v774_v51 = vadd.f32 %v765_v14, %v656_v50 }
 0x17b   : > { %v767_v16 = vpop.f32.mrf.mxu1  ;;  %v842_v17 = vpop.f32.mrf.mxu0 }
 0x17c   : > { %v890_v55 = vadd.f32 %v842_v17, %v772_v46  ;;  %v775_v0 = vadd.f32 %v767_v16, %v657_v60 }
 0x17d   : > { %v769_v18 = vpop.f32.mrf.mxu1  ;;  %v844_v19 = vpop.f32.mrf.mxu0 }
 0x17e   : > { %v891_v56 = vadd.f32 %v844_v19, %v773_v53 }
 0x17f   : > { %v770_v20 = vpop.f32.mrf.mxu1  ;;  %v846_v21 = vpop.f32.mrf.mxu0 }
 0x181   : > { %v883_v22 = vpop.f32.mrf.mxu1  ;;  %v847_v23 = vpop.f32.mrf.mxu0 }
 0x182   : > { %v892_v1 = vadd.f32 %v883_v22, %v774_v51 }
 0x183   : > { %v885_v24 = vpop.f32.mrf.mxu1  ;;  %v960_v25 = vpop.f32.mrf.mxu0 }
 0x184   : > { %v1008_v62 = vadd.f32 %v960_v25, %v890_v55  ;;  %v893_v10 = vadd.f32 %v885_v24, %v775_v0 }
 0x185   : > { %v887_v26 = vpop.f32.mrf.mxu1  ;;  %v962_v27 = vpop.f32.mrf.mxu0 }
 0x186   : > { %v1009_v54 = vadd.f32 %v962_v27, %v891_v56 }
 0x187   : > { %v888_v28 = vpop.f32.mrf.mxu1  ;;  %v964_v29 = vpop.f32.mrf.mxu0 }
 0x189   : > { %v1001_v30 = vpop.f32.mrf.mxu1  ;;  %v965_v31 = vpop.f32.mrf.mxu0 }
 0x18a   : > { %v1010_v63 = vadd.f32 %v1001_v30, %v892_v1 }
 0x18b   : > { %v1003_v32 = vpop.f32.mrf.mxu1  ;;  %v1078_v33 = vpop.f32.mrf.mxu0 }
 0x18c   : > { %v1126_v61 = vadd.f32 %v1078_v33, %v1008_v62  ;;  %v1011_v9 = vadd.f32 %v1003_v32, %v893_v10 }
 0x18d   : > { %v1005_v34 = vpop.f32.mrf.mxu1  ;;  %v1080_v35 = vpop.f32.mrf.mxu0 }
 0x18e   : > { %v1127_v4 = vadd.f32 %v1080_v35, %v1009_v54 }
 0x18f   : > { %v1006_v36 = vpop.f32.mrf.mxu1  ;;  %v1082_v38 = vpop.f32.mrf.mxu0 }
 0x191   : > { %v1119_v39 = vpop.f32.mrf.mxu1  ;;  %v1083_v42 = vpop.f32.mrf.mxu0 }
 0x192   : > { %v1128_v11 = vadd.f32 %v1119_v39, %v1010_v63 }
 0x193   : > { %v1121_v43 = vpop.f32.mrf.mxu1  ;;  %v1196_v47 = vpop.f32.mrf.mxu0 }
 0x194   : > { %v1244_v5 = vadd.f32 %v1196_v47, %v1126_v61  ;;  %v1129_v16 = vadd.f32 %v1121_v43, %v1011_v9 }
 0x195   : > { %v1123_v48 = vpop.f32.mrf.mxu1  ;;  %v1198_v57 = vpop.f32.mrf.mxu0 }
 0x196   : > { %v1245_v12 = vadd.f32 %v1198_v57, %v1127_v4 }
 0x197   : > { %v1124_v59 = vpop.f32.mrf.mxu1  ;;  %v1200_v52 = vpop.f32.mrf.mxu0 }
 0x199   : > { %v1237_v58 = vpop.f32.mrf.mxu1  ;;  %v1201_v2 = vpop.f32.mrf.mxu0 }
 0x19a   : > { %v1246_v17 = vadd.f32 %v1237_v58, %v1128_v11 }
 0x19b   : > { %v1239_v3 = vpop.f32.mrf.mxu1 }
 0x19c   : > { %v1247_v22 = vadd.f32 %v1239_v3, %v1129_v16 }
 0x19d   : > { %v1241_v8 = vpop.f32.mrf.mxu1  ;;  %v1314_v7 = vpop.f32.mrf.mxu0 }
 0x19e   : > { %v1362_v13 = vadd.f32 %v1314_v7, %v1244_v5 }
 0x19f   : > { %v1242_v14 = vpop.f32.mrf.mxu1  ;;  %v1316_v15 = vpop.f32.mrf.mxu0 }
 0x1a0   : > { %v1372_v18 = vadd.f32 %v1370_v6, %v1362_v13  ;;  %v1363_v19 = vadd.f32 %v1316_v15, %v1245_v12 }
 0x1a1   : > { %v1355_v20 = vpop.f32.mrf.mxu1  ;;  %v1318_v21 = vpop.f32.mrf.mxu0 }
 0x1a2   : > { %v1376_v23 = vmax.f32 %v1372_v18, 0.0  ;;  %v1373_v24 = vadd.f32 %v1370_v6, %v1363_v19  ;;  %v1364_v25 = vadd.f32 %v1355_v20, %v1246_v17 }
 0x1a3   : > { %v1357_v26 = vpop.f32.mrf.mxu1  ;;  %v1319_v27 = vpop.f32.mrf.mxu0 }
 0x1a4   : > { %1380 = vst [vmem:[%s263_s10] sm:$0xff] %v1376_v23  ;;  %v1377_v28 = vmax.f32 %v1373_v24, 0.0  ;;  %v1374_v29 = vadd.f32 %v1370_v6, %v1364_v25  ;;  %v1365_v30 = vadd.f32 %v1357_v26, %v1247_v22 }
 0x1a5   : > { %v1359_v31 = vpop.f32.mrf.mxu1 }
 0x1a6   : > { %1381 = vst [vmem:[%s263_s10 + $0x8] sm:$0xff] %v1377_v28  ;;  %v1378_v32 = vmax.f32 %v1374_v29, 0.0  ;;  %v1375_v33 = vadd.f32 %v1370_v6, %v1365_v30 }
 0x1a7   : > { %v1360_v34 = vpop.f32.mrf.mxu1 }
 0x1a8   : > { %1382 = vst [vmem:[%s263_s10 + $0x10] sm:$0xff] %v1378_v32  ;;  %v1379_v35 = vmax.f32 %v1375_v33, 0.0 }
 0x1aa   : > { %1383 = vst [vmem:[%s263_s10 + $0x18] sm:$0xff] %v1379_v35 }
 0x1ab   : > { %1639 = shalt.err (!%p1636_p5)
}
 0x1ac   : > { %s1640_s30 = scalar_lea.hbm %s1399_s21, 512  ;;  %s1644_s7 = scalar_lea.hbm %s2033_s4, 1024 }
 0x1ad   : > { %p1641_p6 = scmp.ne.s32.totalorder %s1399_s21, %s1640_s30  ;;  %p1645_p10 = scmp.lt.s32.totalorder %s1399_s21, %s2033_s4 }
 0x1ae   : > { %p1646_p11 = scmp.lt.s32.totalorder %s1644_s7, %s1640_s30 }
 0x1af   : > { %p1642_p7 = pnand %p1641_p6, %p1780_p4 }
 0x1b0   : > { %p1647_p12 = por %p1646_p11, %p1645_p10 }
 0x1b1   : > { %p1643_p9 = pneg %p1642_p7 }
 0x1b3   : > { %p1648_p13 = pnand %p1647_p12, %p1643_p9 }
 0x1b5   : > { %1651 = shalt.err (!%p1648_p13)
}
 0x1b6   : > { %1558 = dma.vmem_to_hbm [thread:$0]  (%p1780_p4), %s1402_s12, 512, %s1399_s21, %s1385_s22  }
 0x1b7 PF: > { %p1565_p0 = scmp.ge.s32.totalorder %s1702_s20, 2  ;;  %s1413_s10 = sand.u32 1, %s1682_s15  }
 0x1b8   : > { %s1414_s11 = scalar_lea.sflag [#allocation3], %s1413_s10 }
 0x1b9   : > { %p1561_p1 = pnand %p1565_p0, %p1787_p8 }
 0x1bb   : > { %p1562_p2 = pneg %p1561_p1 }
 0x1bd   : > { %1677 = dma.done.wait (%p1562_p2), %s1414_s11, 512  }
 0x1be   : > { %1679 = vsyncadd (%p1562_p2), %s1414_s11, 4294966784  ;;  %s17_s20 = sadd.s32 1, %s1702_s20   ;;  %s2036_s15 = smov %s1686_s16 }
 0x1bf   : > { %p14_p3 = scmp.ge.s32.totalorder %s17_s20, 4   ;;  %s2037_s16 = smov %s1690_s17 }
 0x1c0   : > { %s2038_s17 = smov %s1793_s28  ;;  %s2039_s18 = smov %s1698_s19 }
 0x1c1   : > { %s2040_s19 = smov %s2042_s23  ;;  %16 = sbr.rel (!%p14_p3) target bundleno = 4 (0x4), region = 82 }
 0x1c6   :  { %1419 = vsyncpa [#allocation3], 1 }
 0x1c7   :  { %1421 = vsyncpa [#allocation3 + $0x1], 1 }

</bundles_post_ra>
